<compile_context>
chip_gen: v5e
topology: v5e:2x2
jax: 0.10.0
libtpu: 0.0.40
codegen_flags: <defaults>
</compile_context>

<pallas_src>
import functools

import jax
import jax.numpy as jnp
from jax.experimental import pallas as pl
from jax.experimental.pallas import tpu as pltpu

IN_FEATURES = 40 * 41      # 1640
HIDDEN = 128
OUT_FEATURES = 8
_NEG_BIG = -1e30


def kwsnet_mlp_kernel(x_ref, w1_ref, w2_ref, w3_ref, w4_ref, b_ref, z_ref):
    """One batch tile of fc1..fc4 (+ReLU).  Logits zero-padded to 128 lanes."""
    x = x_ref[...].astype(jnp.bfloat16)                        # (TM, 1640)

    h = jnp.dot(x, w1_ref[...], preferred_element_type=jnp.float32)
    h = jnp.maximum(h + b_ref[0:1, :], 0.0)                    # (TM, 128) f32

    h = jnp.dot(h.astype(jnp.bfloat16), w2_ref[...],
                preferred_element_type=jnp.float32)
    h = jnp.maximum(h + b_ref[1:2, :], 0.0)

    h = jnp.dot(h.astype(jnp.bfloat16), w3_ref[...],
                preferred_element_type=jnp.float32)
    h = jnp.maximum(h + b_ref[2:3, :], 0.0)

    z = jnp.dot(h.astype(jnp.bfloat16), w4_ref[...],
                preferred_element_type=jnp.float32)
    z_ref[...] = z + b_ref[3:4, :]                             # (TM, 128) f32


def kwsnet_softmax_dim0_kernel(z_ref, out_ref, *, valid_rows):
    """Softmax over dim=0 (the batch axis), masking batch-padding rows."""
    z = z_ref[...]                                             # (B_pad, 128)
    row = jax.lax.broadcasted_iota(jnp.int32, z.shape, 0)
    z = jnp.where(row < valid_rows, z, _NEG_BIG)
    z_max = jnp.max(z, axis=0, keepdims=True)                  # (1, 128)
    e = jnp.exp(z - z_max)
    denom = jnp.sum(e, axis=0, keepdims=True)
    inv = pl.reciprocal(denom, approx=True)                    # EUP slot
    inv = inv * (2.0 - denom * inv)                            # one Newton step
    out_ref[...] = e * inv


def kwsnet_forward(x, params):
    """x: (B, 40, 41) float32.  Returns (B, 8) float32 (softmax over dim=0)."""
    B = x.shape[0]
    x_flat = x.reshape(B, -1).astype(jnp.float32)              # (B, 1640)

    (w1, b1), (w2, b2), (w3, b3), (w4, b4) = params

    # bf16 weights; W4/b4 zero-padded to 128 output lanes (lane-dense logits).
    w1b = w1.astype(jnp.bfloat16)
    w2b = w2.astype(jnp.bfloat16)
    w3b = w3.astype(jnp.bfloat16)
    w4b = (jnp.zeros((HIDDEN, HIDDEN), jnp.float32)
           .at[:, :OUT_FEATURES].set(w4).astype(jnp.bfloat16))
    b4p = jnp.zeros((HIDDEN,), jnp.float32).at[:OUT_FEATURES].set(b4)
    biases = jnp.stack([b1, b2, b3, b4p]).astype(jnp.float32)  # (4, 128)

    # Batch tiling: small tiles for tiny batches, 256 rows once B is large
    # enough to feed the MXU; pad B to a tile multiple (padded rows are
    # excluded from the dim=0 softmax below).
    block_m = 256 if B >= 256 else 8
    b_pad = block_m * pl.cdiv(B, block_m)
    if b_pad != B:
        x_flat = jnp.pad(x_flat, ((0, b_pad - B), (0, 0)))

    logits = pl.pallas_call(
        kwsnet_mlp_kernel,
        out_shape=jax.ShapeDtypeStruct((b_pad, HIDDEN), jnp.float32),
        grid_spec=pltpu.PrefetchScalarGridSpec(
            num_scalar_prefetch=0,
            grid=(b_pad // block_m,),
            in_specs=[
                pl.BlockSpec((block_m, IN_FEATURES), lambda i: (i, 0)),  # x streams
                pl.BlockSpec((IN_FEATURES, HIDDEN), lambda i: (0, 0)),   # W1 resident
                pl.BlockSpec((HIDDEN, HIDDEN), lambda i: (0, 0)),        # W2 resident
                pl.BlockSpec((HIDDEN, HIDDEN), lambda i: (0, 0)),        # W3 resident
                pl.BlockSpec((HIDDEN, HIDDEN), lambda i: (0, 0)),        # W4 resident
                pl.BlockSpec((4, HIDDEN), lambda i: (0, 0)),             # biases resident
            ],
            out_specs=pl.BlockSpec((block_m, HIDDEN), lambda i: (i, 0)),
        ),
        compiler_params=pltpu.CompilerParams(
            dimension_semantics=("parallel",)),
    )(x_flat, w1b, w2b, w3b, w4b, biases)

    # Second pass: softmax over the batch axis.  It couples every batch row,
    # so it cannot live inside the batch-tiled kernel above.
    vmem = pl.BlockSpec(memory_space=pltpu.MemorySpace.VMEM)
    probs = pl.pallas_call(
        functools.partial(kwsnet_softmax_dim0_kernel, valid_rows=B),
        out_shape=jax.ShapeDtypeStruct((b_pad, HIDDEN), jnp.float32),
        in_specs=[vmem],
        out_specs=vmem,
    )(logits)

    return probs[:B, :OUT_FEATURES]


def kwsnet_reference(x, params):
    """Pure-JAX reference matched to the kernel's bf16-operand precision."""
    B = x.shape[0]

    def mm(a, w):
        return jnp.dot(a.astype(jnp.bfloat16), w.astype(jnp.bfloat16),
                       preferred_element_type=jnp.float32)

    (w1, b1), (w2, b2), (w3, b3), (w4, b4) = params
    h = x.reshape(B, -1).astype(jnp.float32)
    h = jnp.maximum(mm(h, w1) + b1, 0.0)
    h = jnp.maximum(mm(h, w2) + b2, 0.0)
    h = jnp.maximum(mm(h, w3) + b3, 0.0)
    z = mm(h, w4) + b4
    return jax.nn.softmax(z, axis=0)


def init_params(key):
    """Deterministic synthetic weights with the shapes from KWSNet.__init__."""
    dims = [(IN_FEATURES, HIDDEN), (HIDDEN, HIDDEN),
            (HIDDEN, HIDDEN), (HIDDEN, OUT_FEATURES)]
    params = []
    for i, (fan_in, fan_out) in enumerate(dims):
        kw, kb = jax.random.split(jax.random.fold_in(key, i))
        bound = 1.0 / (fan_in ** 0.5)   # PyTorch-style uniform init
        w = jax.random.uniform(kw, (fan_in, fan_out), jnp.float32,
                               minval=-bound, maxval=bound)
        b = jax.random.uniform(kb, (fan_out,), jnp.float32,
                               minval=-bound, maxval=bound)
        params.append((w, b))
    return params


if __name__ == "__main__":
    key = jax.random.PRNGKey(0)
    k_x, k_p = jax.random.split(key)

    B = 16
    x = jax.random.normal(k_x, (B, 40, 41), dtype=jnp.float32)
    params = init_params(k_p)

    out = jax.jit(kwsnet_forward)(x, params)
    out = jax.block_until_ready(out)

    assert out.shape == (B, OUT_FEATURES)
    # softmax over dim=0: each column sums to 1 across the batch.
    assert jnp.allclose(jnp.sum(out, axis=0), jnp.ones((OUT_FEATURES,)),
                        atol=1e-4)
    ref = kwsnet_reference(x, params)
    assert jnp.allclose(out, ref, atol=2e-3), float(jnp.max(jnp.abs(out - ref)))
    print("KERNEL_OK")
</pallas_src>

<mosaic_0001>
module attributes {stable_mosaic.version = 11 : i64} {
  func.func @kwsnet_mlp_kernel(%arg0: i32, %arg1: memref<8x1640xf32, #tpu.memory_space<vmem>>, %arg2: memref<1640x128xbf16, #tpu.memory_space<vmem>>, %arg3: memref<128x128xbf16, #tpu.memory_space<vmem>>, %arg4: memref<128x128xbf16, #tpu.memory_space<vmem>>, %arg5: memref<128x128xbf16, #tpu.memory_space<vmem>>, %arg6: memref<4x128xf32, #tpu.memory_space<vmem>>, %arg7: memref<8x128xf32, #tpu.memory_space<vmem>>) attributes {dimension_semantics = [#tpu.dimension_semantics<parallel>], iteration_bounds = array<i64: 2>, scalar_prefetch = 0 : i64, scratch_operands = 0 : i64, tpu.core_type = #tpu.core_type<tc>, window_params = [{transform_indices = @transform_0, window_bounds = array<i64: 8, 1640>}, {pipeline_mode = #tpu.pipeline_mode<synchronous>, transform_indices = @transform_1, window_bounds = array<i64: 1640, 128>}, {pipeline_mode = #tpu.pipeline_mode<synchronous>, transform_indices = @transform_2, window_bounds = array<i64: 128, 128>}, {pipeline_mode = #tpu.pipeline_mode<synchronous>, transform_indices = @transform_3, window_bounds = array<i64: 128, 128>}, {pipeline_mode = #tpu.pipeline_mode<synchronous>, transform_indices = @transform_4, window_bounds = array<i64: 128, 128>}, {pipeline_mode = #tpu.pipeline_mode<synchronous>, transform_indices = @transform_5, window_bounds = array<i64: 4, 128>}, {transform_indices = @transform_6, window_bounds = array<i64: 8, 128>}]} {
    %c0 = arith.constant 0 : index
    %c0_0 = arith.constant 0 : index
    %0 = vector.load %arg1[%c0, %c0_0] : memref<8x1640xf32, #tpu.memory_space<vmem>>, vector<8x1640xf32>
    %1 = arith.truncf %0 : vector<8x1640xf32> to vector<8x1640xbf16>
    %c0_1 = arith.constant 0 : index
    %c0_2 = arith.constant 0 : index
    %2 = vector.load %arg2[%c0_1, %c0_2] : memref<1640x128xbf16, #tpu.memory_space<vmem>>, vector<1640x128xbf16>
    %cst = arith.constant dense<0.000000e+00> : vector<8x128xf32>
    %3 = tpu.matmul %1, %2, %cst {dimension_numbers = #tpu.dot_dimension_numbers<[1], [0], [0], [1], [0, 0, 1, 1], [], []>} : vector<8x1640xbf16>, vector<1640x128xbf16>, vector<8x128xf32> -> vector<8x128xf32>
    %c0_3 = arith.constant 0 : index
    %c0_4 = arith.constant 0 : index
    %4 = vector.load %arg6[%c0_3, %c0_4] : memref<4x128xf32, #tpu.memory_space<vmem>>, vector<1x128xf32>
    %5 = vector.broadcast %4 : vector<1x128xf32> to vector<8x128xf32>
    %6 = arith.addf %3, %5 : vector<8x128xf32>
    %cst_5 = arith.constant 0.000000e+00 : f32
    %7 = vector.broadcast %cst_5 : f32 to vector<8x128xf32>
    %8 = arith.maximumf %6, %7 : vector<8x128xf32>
    %9 = arith.truncf %8 : vector<8x128xf32> to vector<8x128xbf16>
    %c0_6 = arith.constant 0 : index
    %c0_7 = arith.constant 0 : index
    %10 = vector.load %arg3[%c0_6, %c0_7] : memref<128x128xbf16, #tpu.memory_space<vmem>>, vector<128x128xbf16>
    %cst_8 = arith.constant dense<0.000000e+00> : vector<8x128xf32>
    %11 = tpu.matmul %9, %10, %cst_8 {dimension_numbers = #tpu.dot_dimension_numbers<[1], [0], [0], [1], [0, 0, 1, 1], [], []>} : vector<8x128xbf16>, vector<128x128xbf16>, vector<8x128xf32> -> vector<8x128xf32>
    %c1 = arith.constant 1 : index
    %c0_9 = arith.constant 0 : index
    %12 = vector.load %arg6[%c1, %c0_9] : memref<4x128xf32, #tpu.memory_space<vmem>>, vector<1x128xf32>
    %13 = vector.broadcast %12 : vector<1x128xf32> to vector<8x128xf32>
    %14 = arith.addf %11, %13 : vector<8x128xf32>
    %cst_10 = arith.constant 0.000000e+00 : f32
    %15 = vector.broadcast %cst_10 : f32 to vector<8x128xf32>
    %16 = arith.maximumf %14, %15 : vector<8x128xf32>
    %17 = arith.truncf %16 : vector<8x128xf32> to vector<8x128xbf16>
    %c0_11 = arith.constant 0 : index
    %c0_12 = arith.constant 0 : index
    %18 = vector.load %arg4[%c0_11, %c0_12] : memref<128x128xbf16, #tpu.memory_space<vmem>>, vector<128x128xbf16>
    %cst_13 = arith.constant dense<0.000000e+00> : vector<8x128xf32>
    %19 = tpu.matmul %17, %18, %cst_13 {dimension_numbers = #tpu.dot_dimension_numbers<[1], [0], [0], [1], [0, 0, 1, 1], [], []>} : vector<8x128xbf16>, vector<128x128xbf16>, vector<8x128xf32> -> vector<8x128xf32>
    %c2 = arith.constant 2 : index
    %c0_14 = arith.constant 0 : index
    %20 = vector.load %arg6[%c2, %c0_14] : memref<4x128xf32, #tpu.memory_space<vmem>>, vector<1x128xf32>
    %21 = vector.broadcast %20 : vector<1x128xf32> to vector<8x128xf32>
    %22 = arith.addf %19, %21 : vector<8x128xf32>
    %cst_15 = arith.constant 0.000000e+00 : f32
    %23 = vector.broadcast %cst_15 : f32 to vector<8x128xf32>
    %24 = arith.maximumf %22, %23 : vector<8x128xf32>
    %25 = arith.truncf %24 : vector<8x128xf32> to vector<8x128xbf16>
    %c0_16 = arith.constant 0 : index
    %c0_17 = arith.constant 0 : index
    %26 = vector.load %arg5[%c0_16, %c0_17] : memref<128x128xbf16, #tpu.memory_space<vmem>>, vector<128x128xbf16>
    %cst_18 = arith.constant dense<0.000000e+00> : vector<8x128xf32>
    %27 = tpu.matmul %25, %26, %cst_18 {dimension_numbers = #tpu.dot_dimension_numbers<[1], [0], [0], [1], [0, 0, 1, 1], [], []>} : vector<8x128xbf16>, vector<128x128xbf16>, vector<8x128xf32> -> vector<8x128xf32>
    %c3 = arith.constant 3 : index
    %c0_19 = arith.constant 0 : index
    %28 = vector.load %arg6[%c3, %c0_19] : memref<4x128xf32, #tpu.memory_space<vmem>>, vector<1x128xf32>
    %29 = vector.broadcast %28 : vector<1x128xf32> to vector<8x128xf32>
    %30 = arith.addf %27, %29 : vector<8x128xf32>
    %c0_20 = arith.constant 0 : index
    %c0_21 = arith.constant 0 : index
    %31 = vector.load %arg7[%c0_20, %c0_21] : memref<8x128xf32, #tpu.memory_space<vmem>>, vector<8x128xf32>
    tpu.vector_store %arg7[%c0_20, %c0_21], %30 {strides = array<i32>} : memref<8x128xf32, #tpu.memory_space<vmem>>, vector<8x128xf32>,
    return
  }
  func.func @transform_0(%arg0: i32) -> (i32, i32) {
    %c0_i32 = arith.constant 0 : i32
    %c0_i32_0 = arith.constant 0 : i32
    return %arg0, %c0_i32 : i32, i32
  }
  func.func @transform_1(%arg0: i32) -> (i32, i32) {
    %c0_i32 = arith.constant 0 : i32
    %c0_i32_0 = arith.constant 0 : i32
    %c0_i32_1 = arith.constant 0 : i32
    return %c0_i32, %c0_i32_0 : i32, i32
  }
  func.func @transform_2(%arg0: i32) -> (i32, i32) {
    %c0_i32 = arith.constant 0 : i32
    %c0_i32_0 = arith.constant 0 : i32
    %c0_i32_1 = arith.constant 0 : i32
    return %c0_i32, %c0_i32_0 : i32, i32
  }
  func.func @transform_3(%arg0: i32) -> (i32, i32) {
    %c0_i32 = arith.constant 0 : i32
    %c0_i32_0 = arith.constant 0 : i32
    %c0_i32_1 = arith.constant 0 : i32
    return %c0_i32, %c0_i32_0 : i32, i32
  }
  func.func @transform_4(%arg0: i32) -> (i32, i32) {
    %c0_i32 = arith.constant 0 : i32
    %c0_i32_0 = arith.constant 0 : i32
    %c0_i32_1 = arith.constant 0 : i32
    return %c0_i32, %c0_i32_0 : i32, i32
  }
  func.func @transform_5(%arg0: i32) -> (i32, i32) {
    %c0_i32 = arith.constant 0 : i32
    %c0_i32_0 = arith.constant 0 : i32
    %c0_i32_1 = arith.constant 0 : i32
    return %c0_i32, %c0_i32_0 : i32, i32
  }
  func.func @transform_6(%arg0: i32) -> (i32, i32) {
    %c0_i32 = arith.constant 0 : i32
    %c0_i32_0 = arith.constant 0 : i32
    return %arg0, %c0_i32 : i32, i32
  }
}

module attributes {stable_mosaic.version = 11 : i64} {
  func.func @kwsnet_softmax_dim0_kernel(%arg0: memref<16x128xf32, #tpu.memory_space<vmem>>, %arg1: memref<16x128xf32, #tpu.memory_space<vmem>>) attributes {dimension_semantics = [], scalar_prefetch = 0 : i64, scratch_operands = 0 : i64, tpu.core_type = #tpu.core_type<tc>} {
    %c0 = arith.constant 0 : index
    %c0_0 = arith.constant 0 : index
    %0 = vector.load %arg0[%c0, %c0_0] : memref<16x128xf32, #tpu.memory_space<vmem>>, vector<16x128xf32>
    %1 = tpu.iota {dimensions = array<i32: 0>} : vector<16x128xi32>
    %c16_i32 = arith.constant 16 : i32
    %2 = vector.broadcast %c16_i32 : i32 to vector<16x128xi32>
    %3 = arith.cmpi slt, %1, %2 : vector<16x128xi32>
    %cst = arith.constant -1.000000e+30 : f32
    %4 = vector.broadcast %cst : f32 to vector<16x128xf32>
    %5 = arith.select %3, %0, %4 : vector<16x128xi1>, vector<16x128xf32>
    %cst_1 = arith.constant dense<0xFF800000> : vector<128xf32>
    %6 = vector.multi_reduction <maximumf>, %5, %cst_1 [0] : vector<16x128xf32> to vector<128xf32>
    %7 = vector.shape_cast %6 : vector<128xf32> to vector<1x128xf32>
    %8 = vector.broadcast %7 : vector<1x128xf32> to vector<16x128xf32>
    %9 = arith.subf %5, %8 : vector<16x128xf32>
    %10 = math.exp %9 : vector<16x128xf32>
    %cst_2 = arith.constant dense<0.000000e+00> : vector<128xf32>
    %11 = vector.multi_reduction <add>, %10, %cst_2 [0] : vector<16x128xf32> to vector<128xf32>
    %12 = vector.shape_cast %11 : vector<128xf32> to vector<1x128xf32>
    %13 = tpu.reciprocal %12 {approx = true} : vector<1x128xf32> -> vector<1x128xf32>
    %14 = arith.mulf %12, %13 : vector<1x128xf32>
    %cst_3 = arith.constant 2.000000e+00 : f32
    %15 = vector.broadcast %cst_3 : f32 to vector<1x128xf32>
    %16 = arith.subf %15, %14 : vector<1x128xf32>
    %17 = arith.mulf %13, %16 : vector<1x128xf32>
    %18 = vector.broadcast %17 : vector<1x128xf32> to vector<16x128xf32>
    %19 = arith.mulf %10, %18 : vector<16x128xf32>
    %c0_4 = arith.constant 0 : index
    %c0_5 = arith.constant 0 : index
    %20 = vector.load %arg1[%c0_4, %c0_5] : memref<16x128xf32, #tpu.memory_space<vmem>>, vector<16x128xf32>
    tpu.vector_store %arg1[%c0_4, %c0_5], %19 {strides = array<i32>} : memref<16x128xf32, #tpu.memory_space<vmem>>, vector<16x128xf32>,
    return
  }
}

</mosaic_0001>

<bundles_post_ra>
// kernel: kwsnet_forward.3
= control target key start
LH: loop header
LB: loop body
LE: loop exit
PB: predicated region body
PF: predicated region fallthrough
CT: control target
= control target key end

     0   :  { %s77_s0 = inlined_call_operand.vmem [shape: f32[16,128], index: 0, kind: input, shape index: {}]   ;;  %s78_s1 = inlined_call_operand.vmem [shape: f32[16,128], index: 1, kind: output, shape index: {}]  }
   0x1   :  { %v8_v0 = vld [vmem:[%s77_s0] sm:$0xff]  ;;  %v9_v1 = vld [vmem:[%s77_s0 + $0x8] sm:$0xff] }
   0x2   :  { %v17_v2 = vmax.f32 %v8_v0, %v9_v1 }
   0x4   :  { %v18_v3 = vrot.slane %v17_v2, 4 }
   0x6   :  { %v19_v4 = vmax.f32 %v17_v2, %v18_v3 }
   0x8   :  { %v20_v5 = vrot.slane %v19_v4, 2 }
   0xa   :  { %v21_v6 = vmax.f32 %v19_v4, %v20_v5 }
   0xc   :  { %v22_v7 = vrot.slane %v21_v6, 1 }
   0xe   :  { %v23_v8 = vmax.f32 %v21_v6, %v22_v7 }
  0x10   :  { %v24_v9 = vsub.f32 %v8_v0, %v23_v8  ;;  %v25_v10 = vsub.f32 %v9_v1, %v23_v8 }
  0x12   :  { %v26_v11 = vmul.f32 1.442695, %v24_v9  ;;  %v28_v12 = vmul.f32 1.442695, %v25_v10 }
  0x14   :  { %49 = vpow2.f32 %v26_v11 }
  0x15   :  { %51 = vpow2.f32 %v28_v12 }
  0x1a   :  { %v50_v13 = vpop.eup %49 }
  0x1b   :  { %v52_v14 = vpop.eup %51 }
  0x1c   :  { %v30_v15 = vadd.f32 %v52_v14, %v50_v13 }
  0x1e   :  { %v31_v16 = vrot.slane %v30_v15, 4 }
  0x20   :  { %v32_v17 = vadd.f32 %v31_v16, %v30_v15 }
  0x22   :  { %v33_v18 = vrot.slane %v32_v17, 2 }
  0x24   :  { %v34_v19 = vadd.f32 %v33_v18, %v32_v17 }
  0x26   :  { %v35_v20 = vrot.slane %v34_v19, 1 }
  0x28   :  { %v36_v21 = vadd.f32 %v35_v20, %v34_v19 }
  0x2a   :  { %53 = vrcp.f32 %v36_v21 }
  0x30   :  { %v54_v22 = vpop.eup %53 }
  0x31   :  { %v38_v23 = vmul.f32 %v54_v22, %v36_v21 }
  0x33   :  { %v39_v24 = vsub.f32 2.0, %v38_v23 }
  0x35   :  { %v40_v25 = vmul.f32 %v54_v22, %v39_v24 }
  0x37   :  { %v41_v26 = vmul.f32 %v50_v13, %v40_v25  ;;  %v42_v27 = vmul.f32 %v52_v14, %v40_v25 }
  0x39   :  { %43 = vst [vmem:[%s78_s1] sm:$0xff] %v41_v26 }
  0x3a   :  { %44 = vst [vmem:[%s78_s1 + $0x8] sm:$0xff] %v42_v27 }

// kernel: kwsnet_forward.2
= control target key start
LH: loop header
LB: loop body
LE: loop exit
PB: predicated region body
PF: predicated region fallthrough
CT: control target
= control target key end

     0   :  { %s2269_s21 = smov 0   ;;  %s2702_s0 = inlined_call_operand.vmem [shape: f32[16,1640], index: 0, kind: input, shape index: {}]   ;;  %s2703_s1 = inlined_call_operand.vmem [shape: bf16[1640,128], index: 1, kind: input, shape index: {}]   ;;  %s2704_s2 = inlined_call_operand.vmem [shape: bf16[128,128], index: 2, kind: input, shape index: {}]   ;;  %s2705_s3 = inlined_call_operand.vmem [shape: bf16[128,128], index: 3, kind: input, shape index: {}]   ;;  %s2706_s4 = inlined_call_operand.vmem [shape: bf16[128,128], index: 4, kind: input, shape index: {}]   ;;  %s2707_s5 = inlined_call_operand.vmem [shape: f32[4,128], index: 5, kind: input, shape index: {}]   ;;  %s2708_s6 = inlined_call_operand.vmem [shape: f32[16,128], index: 6, kind: output, shape index: {}]  }
   0x1 LB: > { %s1573_s22 = sadd.s32 4294967295, %s2232_s21   ;;  %p1577_p0 = scmp.ge.s32.totalorder %s2232_s21, 1  ;;  %s2232_s21 = sphi %s2269_s21, %s16_s21  }
   0x2   : > { %p212_p1 = scmp.lt.s32.totalorder %s2232_s21, 3 }
   0x4   : > { %p213_p2 = pnand %p1577_p0, %p212_p1 }
   0x5   : > { %p241_p3 = scmp.lt.s32.totalorder (!%p213_p2), %s1573_s22, 1 }
   0x6   : > { %216 = sbr.rel (%p213_p2) target bundleno = 677 (0x2a5), region = 44 }
   0xb   : > { %v2094_v0 = vld [vmem:[%s2703_s1 + $0x38] sm:$0xff]  ;;  %v2093_v4 = vld [vmem:[%s2703_s1 + $0x30] sm:$0xff]  ;;  %v2092_v8 = vld [vmem:[%s2703_s1 + $0x28] sm:$0xff]  ;;  %s2710_s22 = smov (!%p241_p3, %s1573_s22), 1  ;;  %vm1103_vm0 = vcmask 1043456   ;;  %vm1099_vm1 = vcmask 850944  }
   0xc   : > { %v2110_v1 = vld [vmem:[%s2703_s1 + $0xb8] sm:$0xff]  ;;  %1107 = vmatpush.bf16.msra.mxu0 %v2094_v0  ;;  %v2109_v5 = vld [vmem:[%s2703_s1 + $0xb0] sm:$0xff]  ;;  %v2108_v9 = vld [vmem:[%s2703_s1 + $0xa8] sm:$0xff]  ;;  %s2213_s27 = smul.u32 104, %s2710_s22  ;;  %s1579_s29 = sshll.u32 %s2710_s22, 3 }
   0xd   : > { %v2102_v2 = vld [vmem:[%s2703_s1 + $0x78] sm:$0xff]  ;;  %1133 = vmatpush.bf16.msra.mxu2 %v2110_v1  ;;  %v2101_v6 = vld [vmem:[%s2703_s1 + $0x70] sm:$0xff]  ;;  %v2100_v10 = vld [vmem:[%s2703_s1 + $0x68] sm:$0xff]  ;;  %s249_s10 = scalar_lea.vmem %s2708_s6, %s1579_s29 }
   0xe   : > { %v2118_v3 = vld [vmem:[%s2703_s1 + $0xf8] sm:$0xff]  ;;  %1120 = vmatpush.bf16.msra.mxu1 %v2102_v2  ;;  %v2117_v7 = vld [vmem:[%s2703_s1 + $0xf0] sm:$0xff]  ;;  %v2116_v11 = vld [vmem:[%s2703_s1 + $0xe8] sm:$0xff]  ;;  %s2371_s14 = scalar_lea.vmem %s2702_s0, %s2213_s27 }
   0xf   : > { %1146 = vmatpush.bf16.msra.mxu3 %v2118_v3  ;;  %v2091_v12 = vld [vmem:[%s2703_s1 + $0x20] sm:$0xff]  ;;  %v2090_v16 = vld [vmem:[%s2703_s1 + $0x18] sm:$0xff]  ;;  %v2089_v20 = vld [vmem:[%s2703_s1 + $0x10] sm:$0xff] }
  0x10   : > { %1108 = vmatpush.bf16.msra.mxu0 %v2093_v4  ;;  %v2107_v13 = vld [vmem:[%s2703_s1 + $0xa0] sm:$0xff]  ;;  %v2106_v17 = vld [vmem:[%s2703_s1 + $0x98] sm:$0xff]  ;;  %v2105_v21 = vld [vmem:[%s2703_s1 + $0x90] sm:$0xff] }
  0x11   : > { %1134 = vmatpush.bf16.msra.mxu2 %v2109_v5  ;;  %v2099_v14 = vld [vmem:[%s2703_s1 + $0x60] sm:$0xff]  ;;  %v2098_v18 = vld [vmem:[%s2703_s1 + $0x58] sm:$0xff]  ;;  %v2097_v22 = vld [vmem:[%s2703_s1 + $0x50] sm:$0xff] }
  0x12   : > { %1121 = vmatpush.bf16.msra.mxu1 %v2101_v6  ;;  %v2115_v15 = vld [vmem:[%s2703_s1 + $0xe0] sm:$0xff]  ;;  %v2114_v19 = vld [vmem:[%s2703_s1 + $0xd8] sm:$0xff]  ;;  %v2113_v23 = vld [vmem:[%s2703_s1 + $0xd0] sm:$0xff] }
  0x13   : > { %1147 = vmatpush.bf16.msra.mxu3 %v2117_v7  ;;  %v2088_v24 = vld [vmem:[%s2703_s1 + $0x8] sm:$0xff]  ;;  %v2087_v28 = vld [vmem:[%s2703_s1] sm:$0xff]  ;;  %v2126_v30 = vld [vmem:[%s2703_s1 + $0x138] sm:$0xff] }
  0x14   : > { %1109 = vmatpush.bf16.msra.mxu0 %v2092_v8  ;;  %v2104_v25 = vld [vmem:[%s2703_s1 + $0x88] sm:$0xff]  ;;  %v2103_v29 = vld [vmem:[%s2703_s1 + $0x80] sm:$0xff]  ;;  %v2142_v31 = vld [vmem:[%s2703_s1 + $0x1b8] sm:$0xff] }
  0x15   : > { %1135 = vmatpush.bf16.msra.mxu2 %v2108_v9  ;;  %v2096_v26 = vld [vmem:[%s2703_s1 + $0x48] sm:$0xff]  ;;  %v253_v32 = vld [vmem:[%s2371_s14 + $0x10] sm:$0xff]  ;;  %v251_v33 = vld [vmem:[%s2371_s14] sm:$0xff] }
  0x16   : > { %1122 = vmatpush.bf16.msra.mxu1 %v2100_v10  ;;  %v2112_v27 = vld [vmem:[%s2703_s1 + $0xc8] sm:$0xff]  ;;  %v2095_v34 = vld [vmem:[%s2703_s1 + $0x40] sm:$0xff]  ;;  %v2134_v36 = vld [vmem:[%s2703_s1 + $0x178] sm:$0xff]  ;;  %v266_v40 = vpack.c.bf16 %v253_v32, %v253_v32  ;;  %v264_v41 = vpack.c.bf16 %v251_v33, %v251_v33 }
  0x17   : > { %1148 = vmatpush.bf16.msra.mxu3 %v2116_v11  ;;  %v2111_v35 = vld [vmem:[%s2703_s1 + $0xc0] sm:$0xff]  ;;  %v2150_v37 = vld [vmem:[%s2703_s1 + $0x1f8] sm:$0xff]  ;;  %v252_v39 = vld [vmem:[%s2371_s14 + $0x8] sm:$0xff] }
  0x18   : > { %1110 = vmatpush.bf16.msra.mxu0 %v2091_v12  ;;  %v254_v38 = vld [vmem:[%s2371_s14 + $0x18] sm:$0xff]  ;;  %v2125_v42 = vld [vmem:[%s2703_s1 + $0x130] sm:$0xff]  ;;  %v265_v45 = vpack.c.bf16 %v252_v39, %v252_v39  ;;  %v2124_v48 = vld [vmem:[%s2703_s1 + $0x128] sm:$0xff] }
  0x19   : > { %1136 = vmatpush.bf16.msra.mxu2 %v2107_v13  ;;  %v2141_v43 = vld [vmem:[%s2703_s1 + $0x1b0] sm:$0xff]  ;;  %v267_v44 = vpack.c.bf16 %v254_v38, %v254_v38  ;;  %v2140_v49 = vld [vmem:[%s2703_s1 + $0x1a8] sm:$0xff]  ;;  %v2123_v52 = vld [vmem:[%s2703_s1 + $0x120] sm:$0xff] }
  0x1a   : > { %1123 = vmatpush.bf16.msra.mxu1 %v2099_v14  ;;  %v2133_v46 = vld [vmem:[%s2703_s1 + $0x170] sm:$0xff]  ;;  %v2132_v50 = vld [vmem:[%s2703_s1 + $0x168] sm:$0xff]  ;;  %v2139_v53 = vld [vmem:[%s2703_s1 + $0x1a0] sm:$0xff] }
  0x1b   : > { %1149 = vmatpush.bf16.msra.mxu3 %v2115_v15  ;;  %v2149_v47 = vld [vmem:[%s2703_s1 + $0x1f0] sm:$0xff]  ;;  %v2148_v51 = vld [vmem:[%s2703_s1 + $0x1e8] sm:$0xff]  ;;  %v2131_v54 = vld [vmem:[%s2703_s1 + $0x160] sm:$0xff] }
  0x1c   : > { %1111 = vmatpush.bf16.msra.mxu0 %v2090_v16  ;;  %v2147_v55 = vld [vmem:[%s2703_s1 + $0x1e0] sm:$0xff]  ;;  %v2122_v56 = vld [vmem:[%s2703_s1 + $0x118] sm:$0xff]  ;;  %v2121_v60 = vld [vmem:[%s2703_s1 + $0x110] sm:$0xff] }
  0x1d   : > { %1137 = vmatpush.bf16.msra.mxu2 %v2106_v17  ;;  %v2138_v57 = vld [vmem:[%s2703_s1 + $0x198] sm:$0xff]  ;;  %v2137_v61 = vld [vmem:[%s2703_s1 + $0x190] sm:$0xff]  ;;  %v2120_v0 = vld [vmem:[%s2703_s1 + $0x108] sm:$0xff] }
  0x1e   : > { %1124 = vmatpush.bf16.msra.mxu1 %v2098_v18  ;;  %v2130_v58 = vld [vmem:[%s2703_s1 + $0x158] sm:$0xff]  ;;  %v2129_v62 = vld [vmem:[%s2703_s1 + $0x150] sm:$0xff]  ;;  %v2136_v1 = vld [vmem:[%s2703_s1 + $0x188] sm:$0xff] }
  0x1f   : > { %1150 = vmatpush.bf16.msra.mxu3 %v2114_v19  ;;  %v2146_v59 = vld [vmem:[%s2703_s1 + $0x1d8] sm:$0xff]  ;;  %v2145_v63 = vld [vmem:[%s2703_s1 + $0x1d0] sm:$0xff]  ;;  %v2128_v2 = vld [vmem:[%s2703_s1 + $0x148] sm:$0xff] }
  0x20   : > { %1112 = vmatpush.bf16.msra.mxu0 %v2089_v20  ;;  %v2144_v3 = vld [vmem:[%s2703_s1 + $0x1c8] sm:$0xff]  ;;  %v2119_v4 = vld [vmem:[%s2703_s1 + $0x100] sm:$0xff]  ;;  %v2158_v6 = vld [vmem:[%s2703_s1 + $0x238] sm:$0xff] }
  0x21   : > { %1138 = vmatpush.bf16.msra.mxu2 %v2105_v21  ;;  %v2135_v5 = vld [vmem:[%s2703_s1 + $0x180] sm:$0xff]  ;;  %v2174_v7 = vld [vmem:[%s2703_s1 + $0x2b8] sm:$0xff]  ;;  %v257_v8 = vld [vmem:[%s2371_s14 + $0x30] sm:$0xff] }
  0x22   : > { %1125 = vmatpush.bf16.msra.mxu1 %v2097_v22  ;;  %v255_v9 = vld [vmem:[%s2371_s14 + $0x20] sm:$0xff]  ;;  %v2166_v12 = vld [vmem:[%s2703_s1 + $0x278] sm:$0xff]  ;;  %v256_v15 = vld [vmem:[%s2371_s14 + $0x28] sm:$0xff]  ;;  %v270_v16 = vpack.c.bf16 %v257_v8, %v257_v8 }
  0x23   : > { %1151 = vmatpush.bf16.msra.mxu3 %v2113_v23  ;;  %v2127_v10 = vld [vmem:[%s2703_s1 + $0x140] sm:$0xff]  ;;  %v2182_v13 = vld [vmem:[%s2703_s1 + $0x2f8] sm:$0xff]  ;;  %v268_v17 = vpack.c.bf16 %v255_v9, %v255_v9  ;;  %v2157_v18 = vld [vmem:[%s2703_s1 + $0x230] sm:$0xff]  ;;  %v269_v21 = vpack.c.bf16 %v256_v15, %v256_v15 }
  0x24   : > { %1113 = vmatpush.bf16.msra.mxu0 %v2088_v24  ;;  %v2143_v11 = vld [vmem:[%s2703_s1 + $0x1c0] sm:$0xff]  ;;  %v258_v14 = vld [vmem:[%s2371_s14 + $0x38] sm:$0xff]  ;;  %v2173_v19 = vld [vmem:[%s2703_s1 + $0x2b0] sm:$0xff] }
  0x25   : > { %1139 = vmatpush.bf16.msra.mxu2 %v2104_v25  ;;  %v271_v20 = vpack.c.bf16 %v258_v14, %v258_v14  ;;  %v2165_v22 = vld [vmem:[%s2703_s1 + $0x270] sm:$0xff]  ;;  %v2156_v24 = vld [vmem:[%s2703_s1 + $0x228] sm:$0xff]  ;;  %v2154_v32 = vld [vmem:[%s2703_s1 + $0x218] sm:$0xff] }
  0x26   : > { %1126 = vmatpush.bf16.msra.mxu1 %v2096_v26  ;;  %v2181_v23 = vld [vmem:[%s2703_s1 + $0x2f0] sm:$0xff]  ;;  %v2172_v25 = vld [vmem:[%s2703_s1 + $0x2a8] sm:$0xff]  ;;  %v2170_v33 = vld [vmem:[%s2703_s1 + $0x298] sm:$0xff] }
  0x27   : > { %1152 = vmatpush.bf16.msra.mxu3 %v2112_v27  ;;  %v2164_v26 = vld [vmem:[%s2703_s1 + $0x268] sm:$0xff]  ;;  %v2169_v38 = vld [vmem:[%s2703_s1 + $0x290] sm:$0xff] }
  0x28   : > { %1114 = vmatpush.bf16.msra.mxu0 %v2087_v28  ;;  %v2180_v27 = vld [vmem:[%s2703_s1 + $0x2e8] sm:$0xff]  ;;  %v2155_v28 = vld [vmem:[%s2703_s1 + $0x220] sm:$0xff]  ;;  %v2161_v39 = vld [vmem:[%s2703_s1 + $0x250] sm:$0xff] }
  0x29   : > { %1140 = vmatpush.bf16.msra.mxu2 %v2103_v29  ;;  %v2171_v29 = vld [vmem:[%s2703_s1 + $0x2a0] sm:$0xff] }
  0x2a   : > { %1127 = vmatpush.bf16.msra.mxu1 %v2095_v34  ;;  %v2162_v34 = vld [vmem:[%s2703_s1 + $0x258] sm:$0xff] }
  0x2b   : > { %1153 = vmatpush.bf16.msra.mxu3 %v2111_v35  ;;  %1115 = vmatmul.bf16.vlgmr.msra.gmra.mxu0 %v264_v41  ;;  %v2178_v35 = vld [vmem:[%s2703_s1 + $0x2d8] sm:$0xff] }
  0x2c   : > { %1159 = vmatpush.bf16.msrb.mxu0 %v2126_v30  ;;  %1141 = vmatmul.bf16.vlgmr.msra.gmra.mxu2 %v266_v40  ;;  %v2163_v30 = vld [vmem:[%s2703_s1 + $0x260] sm:$0xff]  ;;  %v2177_v40 = vld [vmem:[%s2703_s1 + $0x2d0] sm:$0xff] }
  0x2d   : > { %1185 = vmatpush.bf16.msrb.mxu2 %v2142_v31  ;;  %1128 = vmatmul.bf16.vlgmr.msra.gmra.mxu1 %v265_v45  ;;  %v2179_v31 = vld [vmem:[%s2703_s1 + $0x2e0] sm:$0xff]  ;;  %v2176_v45 = vld [vmem:[%s2703_s1 + $0x2c8] sm:$0xff] }
  0x2e   : > { %1172 = vmatpush.bf16.msrb.mxu1 %v2134_v36  ;;  %1154 = vmatmul.bf16.vlgmr.msra.gmra.mxu3 %v267_v44  ;;  %v481_v36 = vld [vmem:[%s2703_s1 + $0x330] sm:$0xf]  ;;  %v2160_v44 = vld [vmem:[%s2703_s1 + $0x248] sm:$0xff] }
  0x2f   : > { %1198 = vmatpush.bf16.msrb.mxu3 %v2150_v37  ;;  %v2153_v37 = vld [vmem:[%s2703_s1 + $0x210] sm:$0xff]  ;;  %v893_v41 = vunpack.c.l.b16 %v481_v36  ;;  %v2204_v36 = vld [vmem:[%s2705_s3 + $0x38] sm:$0xff] }
  0x30   : > { %1160 = vmatpush.bf16.msrb.mxu0 %v2125_v42  ;;  %v2152_v42 = vld [vmem:[%s2703_s1 + $0x208] sm:$0xff] }
  0x31   : > { %1186 = vmatpush.bf16.msrb.mxu2 %v2141_v43  ;;  %v2168_v43 = vld [vmem:[%s2703_s1 + $0x288] sm:$0xff] }
  0x32   : > { %1173 = vmatpush.bf16.msrb.mxu1 %v2133_v46  ;;  %v996_v46 = vpack.c.b16 %v893_v41, %v893_v41 }
  0x33   : > { %1199 = vmatpush.bf16.msrb.mxu3 %v2149_v47  ;;  %v2151_v47 = vld [vmem:[%s2703_s1 + $0x200] sm:$0xff] }
  0x34   : > { %1161 = vmatpush.bf16.msrb.mxu0 %v2124_v48  ;;  %v2167_v48 = vld [vmem:[%s2703_s1 + $0x280] sm:$0xff] }
  0x35   : > { %1187 = vmatpush.bf16.msrb.mxu2 %v2140_v49  ;;  %v259_v49 = vld [vmem:[%s2371_s14 + $0x40] sm:$0xff] }
  0x36   : > { %1174 = vmatpush.bf16.msrb.mxu1 %v2132_v50  ;;  %v261_v50 = vld [vmem:[%s2371_s14 + $0x50] sm:$0xff] }
  0x37   : > { %1200 = vmatpush.bf16.msrb.mxu3 %v2148_v51  ;;  %v2159_v51 = vld [vmem:[%s2703_s1 + $0x240] sm:$0xff] }
  0x38   : > { %1162 = vmatpush.bf16.msrb.mxu0 %v2123_v52  ;;  %v1105_v52 = vsel %vm1103_vm0, %v996_v46, 0 }
  0x39   : > { %1188 = vmatpush.bf16.msrb.mxu2 %v2139_v53  ;;  %v2175_v53 = vld [vmem:[%s2703_s1 + $0x2c0] sm:$0xff] }
  0x3a   : > { %1175 = vmatpush.bf16.msrb.mxu1 %v2131_v54  ;;  %v260_v54 = vld [vmem:[%s2371_s14 + $0x48] sm:$0xff] }
  0x3b   : > { %1201 = vmatpush.bf16.msrb.mxu3 %v2147_v55  ;;  %v262_v55 = vld [vmem:[%s2371_s14 + $0x58] sm:$0xff] }
  0x3c   : > { %1163 = vmatpush.bf16.msrb.mxu0 %v2122_v56  ;;  %v272_v56 = vpack.c.bf16 %v259_v49, %v259_v49 }
  0x3d   : > { %1189 = vmatpush.bf16.msrb.mxu2 %v2138_v57  ;;  %v274_v57 = vpack.c.bf16 %v261_v50, %v261_v50  ;;  %v2200_v50 = vld [vmem:[%s2705_s3 + $0x18] sm:$0xff] }
  0x3e   : > { %1176 = vmatpush.bf16.msrb.mxu1 %v2130_v58  ;;  %v273_v58 = vpack.c.bf16 %v260_v54, %v260_v54 }
  0x3f   : > { %1202 = vmatpush.bf16.msrb.mxu3 %v2146_v59  ;;  %v275_v59 = vpack.c.bf16 %v262_v55, %v262_v55 }
  0x40   : > { %1164 = vmatpush.bf16.msrb.mxu0 %v2121_v60  ;;  %v2188_v60 = vld [vmem:[%s2703_s1 + $0x328] sm:$0xff] }
  0x41   : > { %1190 = vmatpush.bf16.msrb.mxu2 %v2137_v61  ;;  %v2187_v61 = vld [vmem:[%s2703_s1 + $0x320] sm:$0xff] }
  0x42   : > { %1177 = vmatpush.bf16.msrb.mxu1 %v2129_v62  ;;  %v2186_v62 = vld [vmem:[%s2703_s1 + $0x318] sm:$0xff] }
  0x43   : > { %1203 = vmatpush.bf16.msrb.mxu3 %v2145_v63  ;;  %v2185_v63 = vld [vmem:[%s2703_s1 + $0x310] sm:$0xff] }
  0x44   : > { %1165 = vmatpush.bf16.msrb.mxu0 %v2120_v0  ;;  %v2184_v0 = vld [vmem:[%s2703_s1 + $0x308] sm:$0xff] }
  0x45   : > { %1191 = vmatpush.bf16.msrb.mxu2 %v2136_v1  ;;  %v2183_v1 = vld [vmem:[%s2703_s1 + $0x300] sm:$0xff] }
  0x46   : > { %1178 = vmatpush.bf16.msrb.mxu1 %v2128_v2  ;;  %v263_v2 = vld [vmem:[%s2371_s14 + $0x60] sm:$0xff] }
  0x47   : > { %1204 = vmatpush.bf16.msrb.mxu3 %v2144_v3  ;;  %v276_v3 = vpack.c.bf16 %v263_v2, %v263_v2  ;;  %v2208_v2 = vld [vmem:[%s2706_s4 + $0x18] sm:$0xff] }
  0x48   : > { %1166 = vmatpush.bf16.msrb.mxu0 %v2119_v4 }
  0x49   : > { %1192 = vmatpush.bf16.msrb.mxu2 %v2135_v5 }
  0x4a   : > { %1179 = vmatpush.bf16.msrb.mxu1 %v2127_v10 }
  0x4b   : > { %1205 = vmatpush.bf16.msrb.mxu3 %v2143_v11  ;;  %1167 = vmatmul.bf16.vlgmr.msrb.gmra.mxu0 %v268_v17 }
  0x4c   : > { %1211 = vmatpush.bf16.msra.mxu0 %v2158_v6  ;;  %1193 = vmatmul.bf16.vlgmr.msrb.gmra.mxu2 %v270_v16  ;;  %v2194_v16 = vld [vmem:[%s2704_s2 + $0x28] sm:$0xff] }
  0x4d   : > { %1237 = vmatpush.bf16.msra.mxu2 %v2174_v7  ;;  %1180 = vmatmul.bf16.vlgmr.msrb.gmra.mxu1 %v269_v21  ;;  %v2222_v21 = vld [vmem:[%s2707_s5] ss:$0 sm:$0xff] }
  0x4e   : > { %1224 = vmatpush.bf16.msra.mxu1 %v2166_v12  ;;  %1206 = vmatmul.bf16.vlgmr.msrb.gmra.mxu3 %v271_v20  ;;  %v2196_v12 = vld [vmem:[%s2704_s2 + $0x38] sm:$0xff] }
  0x4f   : > { %1250 = vmatpush.bf16.msra.mxu3 %v2182_v13  ;;  %v2195_v13 = vld [vmem:[%s2704_s2 + $0x30] sm:$0xff] }
  0x50   : > { %1212 = vmatpush.bf16.msra.mxu0 %v2157_v18  ;;  %v2193_v18 = vld [vmem:[%s2704_s2 + $0x20] sm:$0xff] }
  0x51   : > { %1238 = vmatpush.bf16.msra.mxu2 %v2173_v19 }
  0x52   : > { %1225 = vmatpush.bf16.msra.mxu1 %v2165_v22 }
  0x53   : > { %1251 = vmatpush.bf16.msra.mxu3 %v2181_v23  ;;  %v2192_v23 = vld [vmem:[%s2704_s2 + $0x18] sm:$0xff] }
  0x54   : > { %1213 = vmatpush.bf16.msra.mxu0 %v2156_v24 }
  0x55   : > { %1239 = vmatpush.bf16.msra.mxu2 %v2172_v25 }
  0x56   : > { %1226 = vmatpush.bf16.msra.mxu1 %v2164_v26  ;;  %v2191_v26 = vld [vmem:[%s2704_s2 + $0x10] sm:$0xff] }
  0x57   : > { %1252 = vmatpush.bf16.msra.mxu3 %v2180_v27 }
  0x58   : > { %1214 = vmatpush.bf16.msra.mxu0 %v2155_v28 }
  0x59   : > { %1240 = vmatpush.bf16.msra.mxu2 %v2171_v29  ;;  %v2190_v29 = vld [vmem:[%s2704_s2 + $0x8] sm:$0xff] }
  0x5a   : > { %1227 = vmatpush.bf16.msra.mxu1 %v2163_v30 }
  0x5b   : > { %1253 = vmatpush.bf16.msra.mxu3 %v2179_v31  ;;  %v2189_v31 = vld [vmem:[%s2704_s2] sm:$0xff] }
  0x5c   : > { %1215 = vmatpush.bf16.msra.mxu0 %v2154_v32 }
  0x5d   : > { %1241 = vmatpush.bf16.msra.mxu2 %v2170_v33 }
  0x5e   : > { %1228 = vmatpush.bf16.msra.mxu1 %v2162_v34 }
  0x5f   : > { %1254 = vmatpush.bf16.msra.mxu3 %v2178_v35 }
  0x60   : > { %1216 = vmatpush.bf16.msra.mxu0 %v2153_v37  ;;  %v2203_v37 = vld [vmem:[%s2705_s3 + $0x30] sm:$0xff] }
  0x61   : > { %1242 = vmatpush.bf16.msra.mxu2 %v2169_v38 }
  0x62   : > { %1229 = vmatpush.bf16.msra.mxu1 %v2161_v39 }
  0x63   : > { %1255 = vmatpush.bf16.msra.mxu3 %v2177_v40 }
  0x64   : > { %1217 = vmatpush.bf16.msra.mxu0 %v2152_v42  ;;  %v2202_v42 = vld [vmem:[%s2705_s3 + $0x28] sm:$0xff] }
  0x65   : > { %1243 = vmatpush.bf16.msra.mxu2 %v2168_v43 }
  0x66   : > { %1230 = vmatpush.bf16.msra.mxu1 %v2160_v44 }
  0x67   : > { %1256 = vmatpush.bf16.msra.mxu3 %v2176_v45  ;;  %v2201_v45 = vld [vmem:[%s2705_s3 + $0x20] sm:$0xff] }
  0x68   : > { %1218 = vmatpush.bf16.msra.mxu0 %v2151_v47 }
  0x69   : > { %1244 = vmatpush.bf16.msra.mxu2 %v2167_v48 }
  0x6a   : > { %1231 = vmatpush.bf16.msra.mxu1 %v2159_v51 }
  0x6b   : > { %1257 = vmatpush.bf16.msra.mxu3 %v2175_v53  ;;  %1219 = vmatmul.bf16.vlgmr.msra.gmra.mxu0 %v272_v56 }
  0x6c   : > { %1264 = vmatpush.bf16.msrb.mxu0 %v1105_v52  ;;  %1245 = vmatmul.bf16.vlgmr.msra.gmra.mxu2 %v274_v57  ;;  %v2199_v52 = vld [vmem:[%s2705_s3 + $0x10] sm:$0xff] }
  0x6d   : > { %1232 = vmatmul.bf16.vlgmr.msra.gmra.mxu1 %v273_v58  ;;  %1425 = vmatpush.bf16.msrb.mxu2 %v2204_v36 }
  0x6e   : > { %1258 = vmatmul.bf16.vlgmr.msra.gmra.mxu3 %v275_v59  ;;  %1344 = vmatpush.bf16.msrb.mxu1 %v2196_v12  ;;  %v2224_v12 = vld [vmem:[%s2707_s5 + $0x2] ss:$0 sm:$0xff] }
  0x70   : > { %1265 = vmatpush.bf16.msrb.mxu0 %v2188_v60  ;;  %v2198_v60 = vld [vmem:[%s2705_s3 + $0x8] sm:$0xff] }
  0x71   : > { %1426 = vmatpush.bf16.msrb.mxu2 %v2203_v37 }
  0x72   : > { %1345 = vmatpush.bf16.msrb.mxu1 %v2195_v13 }
  0x74   : > { %1266 = vmatpush.bf16.msrb.mxu0 %v2187_v61  ;;  %v2197_v61 = vld [vmem:[%s2705_s3] sm:$0xff] }
  0x75   : > { %1427 = vmatpush.bf16.msrb.mxu2 %v2202_v42 }
  0x76   : > { %1346 = vmatpush.bf16.msrb.mxu1 %v2194_v16 }
  0x78   : > { %1267 = vmatpush.bf16.msrb.mxu0 %v2186_v62  ;;  %v2212_v62 = vld [vmem:[%s2706_s4 + $0x38] sm:$0xff] }
  0x79   : > { %1428 = vmatpush.bf16.msrb.mxu2 %v2201_v45  ;;  %1506 = vmatpush.bf16.msrb.mxu3 %v2212_v62 }
  0x7a   : > { %1347 = vmatpush.bf16.msrb.mxu1 %v2193_v18  ;;  %v2225_v18 = vld [vmem:[%s2707_s5 + $0x3] ss:$0 sm:$0xff] }
  0x7c   : > { %1268 = vmatpush.bf16.msrb.mxu0 %v2185_v63  ;;  %v2211_v63 = vld [vmem:[%s2706_s4 + $0x30] sm:$0xff] }
  0x7d   : > { %1429 = vmatpush.bf16.msrb.mxu2 %v2200_v50  ;;  %1507 = vmatpush.bf16.msrb.mxu3 %v2211_v63 }
  0x7e   : > { %1348 = vmatpush.bf16.msrb.mxu1 %v2192_v23 }
  0x80   : > { %1269 = vmatpush.bf16.msrb.mxu0 %v2184_v0  ;;  %v2210_v0 = vld [vmem:[%s2706_s4 + $0x28] sm:$0xff] }
  0x81   : > { %1430 = vmatpush.bf16.msrb.mxu2 %v2199_v52  ;;  %1508 = vmatpush.bf16.msrb.mxu3 %v2210_v0 }
  0x82   : > { %1349 = vmatpush.bf16.msrb.mxu1 %v2191_v26 }
  0x84   : > { %1270 = vmatpush.bf16.msrb.mxu0 %v2183_v1  ;;  %v2209_v1 = vld [vmem:[%s2706_s4 + $0x20] sm:$0xff] }
  0x85   : > { %1431 = vmatpush.bf16.msrb.mxu2 %v2198_v60  ;;  %1509 = vmatpush.bf16.msrb.mxu3 %v2209_v1 }
  0x86   : > { %1350 = vmatpush.bf16.msrb.mxu1 %v2190_v29 }
  0x87   : > { %1988 = vmatmul.msk.bf16.vlgmr.msrb.gmra.mxu0 %vm1099_vm1, %v276_v3  ;;  %v2207_v3 = vld [vmem:[%s2706_s4 + $0x10] sm:$0xff] }
  0x89   : > { %1432 = vmatpush.bf16.msrb.mxu2 %v2197_v61  ;;  %1510 = vmatpush.bf16.msrb.mxu3 %v2208_v2 }
  0x8a   : > { %1351 = vmatpush.bf16.msrb.mxu1 %v2189_v31 }
  0x8d   : > { %1511 = vmatpush.bf16.msrb.mxu3 %v2207_v3 }
  0xa8   : > { %v1116_v4 = vpop.f32.mrf.mxu0 }
  0xa9   : > { %v1117_v24 = vadd.f32 %v2222_v21, %v1116_v4  ;;  %v2223_v4 = vld [vmem:[%s2707_s5 + $0x1] ss:$0 sm:$0xff] }
  0xaa   : > { %v1129_v5 = vpop.f32.mrf.mxu1 }
  0xab   : > { %v1130_v28 = vadd.f32 %v1129_v5, %v1117_v24 }
  0xaf   : > { %v1142_v6 = vpop.f32.mrf.mxu2 }
  0xb0   : > { %v1118_v8 = vpop.f32.mrf.mxu0  ;;  %v1143_v30 = vadd.f32 %v1142_v6, %v1130_v28 }
  0xb1   : > { %v1155_v7 = vpop.f32.mrf.mxu3 }
  0xb2   : > { %v1131_v9 = vpop.f32.mrf.mxu1  ;;  %v1156_v32 = vadd.f32 %v1155_v7, %v1143_v30 }
  0xb7   : > { %v1144_v10 = vpop.f32.mrf.mxu2 }
  0xb8   : > { %v2206_v10 = vld [vmem:[%s2706_s4 + $0x8] sm:$0xff] }
  0xb9   : > { %v1157_v11 = vpop.f32.mrf.mxu3  ;;  %1512 = vmatpush.bf16.msrb.mxu3 %v2206_v10 }
  0xba   : > { %v2205_v11 = vld [vmem:[%s2706_s4] sm:$0xff] }
  0xbd   : > { %1513 = vmatpush.bf16.msrb.mxu3 %v2205_v11 }
  0xc8   : > { %v1168_v14 = vpop.f32.mrf.mxu0 }
  0xc9   : > { %v1169_v34 = vadd.f32 %v1168_v14, %v1156_v32 }
  0xca   : > { %v1181_v15 = vpop.f32.mrf.mxu1 }
  0xcb   : > { %v1182_v38 = vadd.f32 %v1181_v15, %v1169_v34 }
  0xcf   : > { %v1194_v17 = vpop.f32.mrf.mxu2 }
  0xd0   : > { %v1170_v20 = vpop.f32.mrf.mxu0  ;;  %v1195_v43 = vadd.f32 %v1194_v17, %v1182_v38 }
  0xd1   : > { %v1207_v19 = vpop.f32.mrf.mxu3 }
  0xd2   : > { %v1183_v22 = vpop.f32.mrf.mxu1  ;;  %v1208_v46 = vadd.f32 %v1207_v19, %v1195_v43 }
  0xd7   : > { %v1196_v25 = vpop.f32.mrf.mxu2 }
  0xd9   : > { %v1209_v27 = vpop.f32.mrf.mxu3 }
  0xe8   : > { %v1220_v33 = vpop.f32.mrf.mxu0 }
  0xe9   : > { %v1221_v48 = vadd.f32 %v1220_v33, %v1208_v46 }
  0xea   : > { %v1233_v35 = vpop.f32.mrf.mxu1 }
  0xeb   : > { %v1234_v51 = vadd.f32 %v1233_v35, %v1221_v48 }
  0xef   : > { %v1246_v39 = vpop.f32.mrf.mxu2 }
  0xf0   : > { %v1222_v41 = vpop.f32.mrf.mxu0  ;;  %v1247_v53 = vadd.f32 %v1246_v39, %v1234_v51 }
  0xf1   : > { %v1259_v40 = vpop.f32.mrf.mxu3 }
  0xf2   : > { %v1235_v44 = vpop.f32.mrf.mxu1  ;;  %v1260_v54 = vadd.f32 %v1259_v40, %v1247_v53 }
  0xf7   : > { %v1248_v47 = vpop.f32.mrf.mxu2 }
  0xf9   : > { %v1261_v49 = vpop.f32.mrf.mxu3 }
 0x104   : > { %v1272_v55 = vpop.f32.mrf.mxu0 }
 0x105   : > { %v1273_v56 = vadd.f32 %v1272_v55, %v1260_v54 }
 0x107   : > { %v1276_v57 = vmax.f32 %v1273_v56, 0.0 }
 0x109   : > { %v1277_v58 = vpack.c.bf16 %v1276_v57, %v1276_v57 }
 0x10b   : > { %1352 = vmatmul.bf16.vlgmr.msrb.gmra.mxu1 %v1277_v58 }
 0x10c   : > { %v1274_v59 = vpop.f32.mrf.mxu0 }
 0x188   : > { %v1353_v5 = vpop.f32.mrf.mxu1 }
 0x189   : > { %v1354_v6 = vadd.f32 %v2223_v4, %v1353_v5 }
 0x18b   : > { %v1357_v7 = vmax.f32 %v1354_v6, 0.0 }
 0x18d   : > { %v1358_v8 = vpack.c.bf16 %v1357_v7, %v1357_v7 }
 0x18f   : > { %1433 = vmatmul.bf16.vlgmr.msrb.gmra.mxu2 %v1358_v8 }
 0x190   : > { %v1355_v9 = vpop.f32.mrf.mxu1 }
 0x212   : > { %v1434_v13 = vpop.f32.mrf.mxu2 }
 0x213   : > { %v1435_v14 = vadd.f32 %v2224_v12, %v1434_v13 }
 0x215   : > { %v1438_v15 = vmax.f32 %v1435_v14, 0.0 }
 0x217   : > { %v1439_v16 = vpack.c.bf16 %v1438_v15, %v1438_v15 }
 0x219   : > { %1514 = vmatmul.bf16.vlgmr.msrb.gmra.mxu3 %v1439_v16 }
 0x21a   : > { %v1436_v17 = vpop.f32.mrf.mxu2 }
 0x29c   : > { %v1515_v19 = vpop.f32.mrf.mxu3 }
 0x29d   : > { %v1516_v20 = vadd.f32 %v2225_v18, %v1515_v19 }
 0x29f   : > { %1519 = vst [vmem:[%s249_s10] sm:$0xff] %v1516_v20 }
 0x2a4   : > { %v1517_v21 = vpop.f32.mrf.mxu3 }
 0x2a5 PF: > { %s16_s21 = sadd.s32 1, %s2232_s21  }
 0x2a6   : > { %p13_p4 = scmp.ge.s32.totalorder %s16_s21, 4  }
 0x2a8   :  { %15 = sbr.rel (!%p13_p4) target bundleno = 1 (0x1), region = 74 }

</bundles_post_ra>
